<compile_context>
chip_gen: v7x
topology: tpu7x:2x2x1
jax: 0.10.0
libtpu: 0.0.40
codegen_flags: <defaults>
</compile_context>

<pallas_src>
import functools

import jax
import jax.numpy as jnp
from jax.experimental import pallas as pl
from jax.experimental.pallas import tpu as pltpu

D_FF = 4  # expansion factor, matches FFN.d_ff


def _round_up(x: int, n: int) -> int:
    return (x + n - 1) // n * n


# ---------------------------------------------------------------------------
# Kernel body
# ---------------------------------------------------------------------------
def _ffn_kernel(x_ref, w1_ref, b1_ref, w2_ref, b2_ref, o_ref, acc_ref):
    # x_ref:  (tm, d_pad)    row tile (same tile across hidden steps)
    # w1_ref: (d_pad, tn)    hidden-column slice of W1
    # b1_ref: (1, tn)        matching slice of b1
    # w2_ref: (tn, d_pad)    hidden-row slice of W2
    # b2_ref: (1, d_pad)     full b2 (folded into the accumulator init)
    # o_ref:  (tm, d_pad)    resident across the hidden axis, written at the end
    # acc_ref:(tm, d_pad)    f32 VMEM accumulator
    n = pl.program_id(1)

    @pl.when(n == 0)
    def _init():
        # Fold the second bias into the accumulator init instead of adding it
        # on every hidden step.
        acc_ref[...] = jnp.broadcast_to(
            b2_ref[...].astype(jnp.float32), acc_ref.shape)

    h = jnp.dot(x_ref[...], w1_ref[...], preferred_element_type=jnp.float32)
    # Bias + ReLU stay in f32 (v5e has no bf16 VALU; this hides under the MXU).
    h = jnp.maximum(h + b1_ref[...].astype(jnp.float32), 0.0)
    acc_ref[...] += jnp.dot(h.astype(w2_ref.dtype), w2_ref[...],
                            preferred_element_type=jnp.float32)

    @pl.when(n == pl.num_programs(1) - 1)
    def _finalize():
        # TODO(synk): nn.Dropout is identity in eval mode; train-mode parity
        # would use pltpu.prng_seed + pltpu.prng_random_bits here.
        o_ref[...] = acc_ref[...].astype(o_ref.dtype)


# ---------------------------------------------------------------------------
# Tile / VMEM sizing
# ---------------------------------------------------------------------------
def _vmem_capacity_bytes() -> int:
    try:
        return int(pltpu.get_tpu_info().vmem_capacity_bytes)
    except Exception:
        return 64 * 2**20  # conservative fallback: v7x per-TensorCore VMEM


def _vmem_need_bytes(tm, tn, d_pad, x_bytes, w_bytes):
    """Footprint of all live VMEM buffers: double-buffered pipeline tiles,
    the f32 accumulator, and the (tm, tn) intermediate + its cast copy."""
    need = 2 * tm * d_pad * x_bytes            # x row tiles
    need += 2 * d_pad * tn * w_bytes           # W1 slices
    need += 2 * tn * d_pad * w_bytes           # W2 slices
    need += 2 * 8 * tn * w_bytes               # b1 slices (sublane-padded)
    need += 2 * 8 * d_pad * w_bytes            # b2
    need += 2 * tm * d_pad * x_bytes           # output tiles
    need += tm * d_pad * 4                     # f32 accumulator scratch
    need += tm * tn * 4 + tm * tn * w_bytes    # intermediate h + its cast copy
    return need


def _select_tiles(m, d_pad, h_pad, x_bytes, w_bytes):
    """Pick (tm, tn, vmem_limit).  Larger tm = higher arithmetic intensity on
    the weight stream; larger tn amortizes accumulator RMW + grid-step cost."""
    vmem_cap = _vmem_capacity_bytes()
    small_vmem = vmem_cap <= 80 * 2**20           # v7x-like: 64 MiB per TC
    budget = min(int(vmem_cap * 0.85), 100 * 2**20)

    m_ceil = _round_up(m, 128)
    tm_target = 512 if small_vmem else 1024
    tm_cap = max(128, min(tm_target, m_ceil))
    if small_vmem and m_ceil >= 256:
        # keep grid[0] >= 2 so the "parallel" row axis shards across both TCs
        tm_cap = max(128, min(tm_cap, _round_up(pl.cdiv(m_ceil, 2), 128)))

    tn_target = 512 if small_vmem else 1024
    tn_cands = [t for t in range(128, min(h_pad, tn_target) + 1, 128)
                if h_pad % t == 0]
    if not tn_cands:
        tn_cands = [128]
    tn_cands = sorted(tn_cands, reverse=True)

    tm_sel, tn_sel = 128, tn_cands[-1]
    done = False
    for tm in range(tm_cap, 127, -128):
        for tn in tn_cands:
            if _vmem_need_bytes(tm, tn, d_pad, x_bytes, w_bytes) <= budget:
                tm_sel, tn_sel = tm, tn
                done = True
                break
        if done:
            break

    need = _vmem_need_bytes(tm_sel, tn_sel, d_pad, x_bytes, w_bytes)
    vmem_limit = int(min(max(int(need * 1.25), 16 * 2**20), budget))
    vmem_limit = max(vmem_limit, int(need))  # never clamp below the real need
    return tm_sel, tn_sel, vmem_limit


# ---------------------------------------------------------------------------
# Host-side wrappers
# ---------------------------------------------------------------------------
def pad_ffn_params(w1, b1, w2, b2):
    """Pad FFN weights ONCE (outside the per-call path) to lane-aligned
    (multiple-of-128) shapes.  Weights in (in, out) layout; biases (1, out)."""
    d_model, hidden = w1.shape
    d_pad = _round_up(d_model, 128)
    h_pad = _round_up(hidden, 128)
    w1p = jnp.pad(w1, ((0, d_pad - d_model), (0, h_pad - hidden)))
    b1p = jnp.pad(jnp.reshape(b1, (1, hidden)), ((0, 0), (0, h_pad - hidden)))
    w2p = jnp.pad(w2, ((0, h_pad - hidden), (0, d_pad - d_model)))
    b2p = jnp.pad(jnp.reshape(b2, (1, d_model)), ((0, 0), (0, d_pad - d_model)))
    return w1p, b1p, w2p, b2p


@functools.partial(jax.jit, static_argnames=("tm", "tn", "vmem_limit"))
def _ffn_forward_2d(x2d, w1p, b1p, w2p, b2p, *, tm, tn, vmem_limit):
    m, d_model = x2d.shape
    d_pad, h_pad = w1p.shape
    m_pad = _round_up(m, tm)

    if (m_pad, d_pad) != (m, d_model):
        # Only the activations are padded per call (weights are pre-padded).
        x2d = jnp.pad(x2d, ((0, m_pad - m), (0, d_pad - d_model)))

    grid = (m_pad // tm, h_pad // tn)

    x_bytes = jnp.dtype(x2d.dtype).itemsize
    w_bytes = jnp.dtype(w1p.dtype).itemsize
    flops = 2 * 2 * m_pad * d_pad * h_pad  # two matmuls
    # Weight matrices are streamed from HBM once per row tile (grid[0] passes).
    weight_bytes = (w1p.size + w2p.size + b1p.size + b2p.size) * w_bytes
    bytes_accessed = (m_pad * d_pad * x_bytes          # x read
                      + m_pad * d_pad * x_bytes        # out write
                      + grid[0] * weight_bytes)        # streamed weights
    cost = pl.CostEstimate(flops=int(flops), transcendentals=0,
                           bytes_accessed=int(bytes_accessed))

    out2d = pl.pallas_call(
        _ffn_kernel,
        out_shape=jax.ShapeDtypeStruct((m_pad, d_pad), x2d.dtype),
        grid_spec=pltpu.PrefetchScalarGridSpec(
            num_scalar_prefetch=0,
            grid=grid,
            in_specs=[
                pl.BlockSpec((tm, d_pad), lambda i, n: (i, 0)),   # x rows
                pl.BlockSpec((d_pad, tn), lambda i, n: (0, n)),   # W1 slice
                pl.BlockSpec((1, tn), lambda i, n: (0, n)),       # b1 slice
                pl.BlockSpec((tn, d_pad), lambda i, n: (n, 0)),   # W2 slice
                pl.BlockSpec((1, d_pad), lambda i, n: (0, 0)),    # b2
            ],
            out_specs=pl.BlockSpec((tm, d_pad), lambda i, n: (i, 0)),
            scratch_shapes=[pltpu.VMEM((tm, d_pad), jnp.float32)],
        ),
        compiler_params=pltpu.CompilerParams(
            dimension_semantics=("parallel", "arbitrary"),
            vmem_limit_bytes=int(vmem_limit)),
        cost_estimate=cost,
    )(x2d, w1p, b1p, w2p, b2p)

    return out2d[:m, :d_model]


def ffn_forward(x, w1p, b1p, w2p, b2p):
    """x: (batch, seq, d_model) -> (batch, seq, d_model).

    Weights must be pre-padded with pad_ffn_params (in/out dims multiples of
    128), keeping the per-call path free of weight copies."""
    batch, seq, d_model = x.shape
    d_pad, h_pad = w1p.shape
    assert d_pad % 128 == 0 and h_pad % 128 == 0, "call pad_ffn_params first"
    assert d_pad >= d_model and w2p.shape == (h_pad, d_pad)

    m = batch * seq
    tm, tn, vmem_limit = _select_tiles(
        m, d_pad, h_pad,
        jnp.dtype(x.dtype).itemsize, jnp.dtype(w1p.dtype).itemsize)
    out2d = _ffn_forward_2d(x.reshape(m, d_model), w1p, b1p, w2p, b2p,
                            tm=tm, tn=tn, vmem_limit=vmem_limit)
    return out2d.reshape(batch, seq, d_model)


# ---------------------------------------------------------------------------
# Params / reference
# ---------------------------------------------------------------------------
def init_ffn_params(key, d_model, dtype=jnp.float32):
    """Deterministic synthetic params in (in, out) layout for the kernel
    (torch stores Linear weights as (out, in) and computes x @ W.T)."""
    hidden = d_model * D_FF
    k1, k2, k3, k4 = jax.random.split(key, 4)
    lim1 = 1.0 / (d_model ** 0.5)
    lim2 = 1.0 / (hidden ** 0.5)
    w1 = jax.random.uniform(k1, (d_model, hidden), jnp.float32, -lim1, lim1)
    b1 = jax.random.uniform(k2, (1, hidden), jnp.float32, -lim1, lim1)
    w2 = jax.random.uniform(k3, (hidden, d_model), jnp.float32, -lim2, lim2)
    b2 = jax.random.uniform(k4, (1, d_model), jnp.float32, -lim2, lim2)
    return tuple(p.astype(dtype) for p in (w1, b1, w2, b2))


def ffn_ref(x, w1, b1, w2, b2):
    """Plain-JAX reference (eval-mode FFN), mirroring the kernel's casts."""
    f32 = jnp.float32
    b, s, d = x.shape
    x2 = x.reshape(-1, d).astype(f32)
    h = jnp.maximum(x2 @ w1.astype(f32) + b1.reshape(1, -1).astype(f32), 0.0)
    h = h.astype(w2.dtype).astype(f32)  # mirror intermediate cast before 2nd dot
    y = h @ w2.astype(f32) + b2.reshape(1, -1).astype(f32)
    return y.reshape(b, s, d)


if __name__ == "__main__":
    key = jax.random.PRNGKey(0)
    kx, kp, kx2, kp2 = jax.random.split(key, 4)

    # Case 1: small module-like shapes, f32 (d_model=32 -> hidden=128;
    # lanes/rows padded to 128 by pad_ffn_params / the wrapper).
    batch, seq, d_model = 2, 8, 32
    x = jax.random.normal(kx, (batch, seq, d_model), dtype=jnp.float32)
    w1, b1, w2, b2 = init_ffn_params(kp, d_model, jnp.float32)
    padded = pad_ffn_params(w1, b1, w2, b2)      # once, outside the hot path
    out = ffn_forward(x, *padded)
    jax.block_until_ready(out)
    ref = ffn_ref(x, w1, b1, w2, b2)
    assert out.shape == (batch, seq, d_model)
    assert jnp.allclose(out, ref, atol=1e-4, rtol=1e-4), (
        "f32 mismatch, max abs err = %g" % float(jnp.max(jnp.abs(out - ref))))

    # Case 2: bf16 activations/weights with f32 accumulation; exercises the
    # row tiling and the hidden-reduction ("arbitrary") grid axis.
    batch2, seq2, d_model2 = 4, 128, 256   # hidden = 1024, m = 512
    x2 = jax.random.normal(
        kx2, (batch2, seq2, d_model2), dtype=jnp.float32).astype(jnp.bfloat16)
    p2 = init_ffn_params(kp2, d_model2, jnp.bfloat16)
    padded2 = pad_ffn_params(*p2)
    out2 = ffn_forward(x2, *padded2)
    jax.block_until_ready(out2)
    ref2 = ffn_ref(x2, *p2)
    assert out2.shape == (batch2, seq2, d_model2)
    err2 = float(jnp.max(jnp.abs(out2.astype(jnp.float32) - ref2)))
    assert jnp.allclose(out2.astype(jnp.float32), ref2, atol=3e-2, rtol=3e-2), (
        "bf16 mismatch, max abs err = %g" % err2)

    print("KERNEL_OK")
</pallas_src>

<mosaic_0001>
module attributes {stable_mosaic.version = 11 : i64} {
  func.func @_ffn_kernel(%arg0: i32, %arg1: i32, %arg2: memref<128x128xf32, #tpu.memory_space<vmem>>, %arg3: memref<128x128xf32, #tpu.memory_space<vmem>>, %arg4: memref<1x128xf32, #tpu.memory_space<vmem>>, %arg5: memref<128x128xf32, #tpu.memory_space<vmem>>, %arg6: memref<1x128xf32, #tpu.memory_space<vmem>>, %arg7: memref<128x128xf32, #tpu.memory_space<vmem>>, %arg8: memref<128x128xf32, #tpu.memory_space<vmem>>) attributes {dimension_semantics = [#tpu.dimension_semantics<parallel>, #tpu.dimension_semantics<arbitrary>], iteration_bounds = array<i64: 1, 1>, scalar_prefetch = 0 : i64, scratch_operands = 1 : i64, tpu.core_type = #tpu.core_type<tc>, window_params = [{transform_indices = @transform_0, window_bounds = array<i64: 128, 128>}, {transform_indices = @transform_1, window_bounds = array<i64: 128, 128>}, {transform_indices = @transform_2, window_bounds = array<i64: 1, 128>}, {transform_indices = @transform_3, window_bounds = array<i64: 128, 128>}, {pipeline_mode = #tpu.pipeline_mode<synchronous>, transform_indices = @transform_4, window_bounds = array<i64: 1, 128>}, {transform_indices = @transform_5, window_bounds = array<i64: 128, 128>}]} {
    %c0_i32 = arith.constant 0 : i32
    %0 = arith.cmpi eq, %arg1, %c0_i32 : i32
    %1 = arith.extui %0 : i1 to i32
    %c0_i32_0 = arith.constant 0 : i32
    %2 = arith.cmpi ne, %1, %c0_i32_0 : i32
    scf.if %2 {
      %c0_16 = arith.constant 0 : index
      %c0_17 = arith.constant 0 : index
      %19 = vector.load %arg6[%c0_16, %c0_17] : memref<1x128xf32, #tpu.memory_space<vmem>>, vector<1x128xf32>
      %20 = vector.shape_cast %19 : vector<1x128xf32> to vector<1x128xf32>
      %21 = vector.broadcast %20 : vector<1x128xf32> to vector<128x128xf32>
      %c0_18 = arith.constant 0 : index
      %c0_19 = arith.constant 0 : index
      %22 = vector.load %arg8[%c0_18, %c0_19] : memref<128x128xf32, #tpu.memory_space<vmem>>, vector<128x128xf32>
      tpu.vector_store %arg8[%c0_18, %c0_19], %21 {strides = array<i32>} : memref<128x128xf32, #tpu.memory_space<vmem>>, vector<128x128xf32>,
    } else {
    }
    %c0 = arith.constant 0 : index
    %c0_1 = arith.constant 0 : index
    %3 = vector.load %arg2[%c0, %c0_1] : memref<128x128xf32, #tpu.memory_space<vmem>>, vector<128x128xf32>
    %c0_2 = arith.constant 0 : index
    %c0_3 = arith.constant 0 : index
    %4 = vector.load %arg3[%c0_2, %c0_3] : memref<128x128xf32, #tpu.memory_space<vmem>>, vector<128x128xf32>
    %cst = arith.constant dense<0.000000e+00> : vector<128x128xf32>
    %5 = tpu.matmul %3, %4, %cst {dimension_numbers = #tpu.dot_dimension_numbers<[1], [0], [0], [1], [0, 0, 1, 1], [], []>} : vector<128x128xf32>, vector<128x128xf32>, vector<128x128xf32> -> vector<128x128xf32>
    %c0_4 = arith.constant 0 : index
    %c0_5 = arith.constant 0 : index
    %6 = vector.load %arg4[%c0_4, %c0_5] : memref<1x128xf32, #tpu.memory_space<vmem>>, vector<1x128xf32>
    %7 = vector.broadcast %6 : vector<1x128xf32> to vector<128x128xf32>
    %8 = arith.addf %5, %7 : vector<128x128xf32>
    %cst_6 = arith.constant 0.000000e+00 : f32
    %9 = vector.broadcast %cst_6 : f32 to vector<128x128xf32>
    %10 = arith.maximumf %8, %9 : vector<128x128xf32>
    %c0_7 = arith.constant 0 : index
    %c0_8 = arith.constant 0 : index
    %11 = vector.load %arg8[%c0_7, %c0_8] : memref<128x128xf32, #tpu.memory_space<vmem>>, vector<128x128xf32>
    %c0_9 = arith.constant 0 : index
    %c0_10 = arith.constant 0 : index
    %12 = vector.load %arg5[%c0_9, %c0_10] : memref<128x128xf32, #tpu.memory_space<vmem>>, vector<128x128xf32>
    %cst_11 = arith.constant dense<0.000000e+00> : vector<128x128xf32>
    %13 = tpu.matmul %10, %12, %cst_11 {dimension_numbers = #tpu.dot_dimension_numbers<[1], [0], [0], [1], [0, 0, 1, 1], [], []>} : vector<128x128xf32>, vector<128x128xf32>, vector<128x128xf32> -> vector<128x128xf32>
    %14 = arith.addf %11, %13 : vector<128x128xf32>
    %c0_12 = arith.constant 0 : index
    %c0_13 = arith.constant 0 : index
    %15 = vector.load %arg8[%c0_12, %c0_13] : memref<128x128xf32, #tpu.memory_space<vmem>>, vector<128x128xf32>
    tpu.vector_store %arg8[%c0_12, %c0_13], %14 {strides = array<i32>} : memref<128x128xf32, #tpu.memory_space<vmem>>, vector<128x128xf32>,
    %c0_i32_14 = arith.constant 0 : i32
    %16 = arith.cmpi eq, %arg1, %c0_i32_14 : i32
    %17 = arith.extui %16 : i1 to i32
    %c0_i32_15 = arith.constant 0 : i32
    %18 = arith.cmpi ne, %17, %c0_i32_15 : i32
    scf.if %18 {
      %c0_16 = arith.constant 0 : index
      %c0_17 = arith.constant 0 : index
      %19 = vector.load %arg8[%c0_16, %c0_17] : memref<128x128xf32, #tpu.memory_space<vmem>>, vector<128x128xf32>
      %c0_18 = arith.constant 0 : index
      %c0_19 = arith.constant 0 : index
      %20 = vector.load %arg7[%c0_18, %c0_19] : memref<128x128xf32, #tpu.memory_space<vmem>>, vector<128x128xf32>
      tpu.vector_store %arg7[%c0_18, %c0_19], %19 {strides = array<i32>} : memref<128x128xf32, #tpu.memory_space<vmem>>, vector<128x128xf32>,
    } else {
    }
    return
  }
  func.func @transform_0(%arg0: i32, %arg1: i32) -> (i32, i32) {
    %c0_i32 = arith.constant 0 : i32
    %c0_i32_0 = arith.constant 0 : i32
    return %arg0, %c0_i32 : i32, i32
  }
  func.func @transform_1(%arg0: i32, %arg1: i32) -> (i32, i32) {
    %c0_i32 = arith.constant 0 : i32
    %c0_i32_0 = arith.constant 0 : i32
    return %c0_i32, %arg1 : i32, i32
  }
  func.func @transform_2(%arg0: i32, %arg1: i32) -> (i32, i32) {
    %c0_i32 = arith.constant 0 : i32
    %c0_i32_0 = arith.constant 0 : i32
    return %c0_i32, %arg1 : i32, i32
  }
  func.func @transform_3(%arg0: i32, %arg1: i32) -> (i32, i32) {
    %c0_i32 = arith.constant 0 : i32
    %c0_i32_0 = arith.constant 0 : i32
    return %arg1, %c0_i32 : i32, i32
  }
  func.func @transform_4(%arg0: i32, %arg1: i32) -> (i32, i32) {
    %c0_i32 = arith.constant 0 : i32
    %c0_i32_0 = arith.constant 0 : i32
    %c0_i32_1 = arith.constant 0 : i32
    return %c0_i32, %c0_i32_0 : i32, i32
  }
  func.func @transform_5(%arg0: i32, %arg1: i32) -> (i32, i32) {
    %c0_i32 = arith.constant 0 : i32
    %c0_i32_0 = arith.constant 0 : i32
    return %arg0, %c0_i32 : i32, i32
  }
}

</mosaic_0001>

<bundles_post_ra>
// kernel: _ffn_forward_2d.1
= control target key start
LH: loop header
LB: loop body
LE: loop exit
PB: predicated region body
PF: predicated region fallthrough
CT: control target
= control target key end

     0   :  { %10 = vsyncpa [#allocation4], 0  ;;  %s779_s18 = smov [#allocation3]   ;;  %s974_s0 = inlined_call_operand.vmem [shape: f32[128,128], index: 0, kind: input, shape index: {}]   ;;  %s975_s1 = inlined_call_operand.vmem [shape: f32[128,128], index: 1, kind: input, shape index: {}]   ;;  %s976_s2 = inlined_call_operand.vmem [shape: f32[1,128], index: 2, kind: input, shape index: {}]   ;;  %s977_s3 = inlined_call_operand.hbm [shape: f32[128,128], index: 3, kind: input, shape index: {}]   ;;  %s978_s4 = inlined_call_operand.vmem [shape: f32[1,128], index: 4, kind: input, shape index: {}]   ;;  %s979_s5 = inlined_call_operand.vmem [shape: f32[128,128], index: 5, kind: output, shape index: {}]  }
   0x1   :  { %s22_s19 = sshll.u32 %s779_s18, 4  ;;  %s755_s22 = scalar_lea.hbm %s977_s3, 2048  ;;  %s23_s19 = int_to_ptr.vmem [resolvable:$true] %s22_s19 }
   0x2   :  { %p756_p0 = scmp.ne.s32.totalorder %s977_s3, %s755_s22  ;;  %p759_p1 = scmp.lt.u32.totalorder %s755_s22, %s977_s3 }
   0x4   :  { %p761_p2 = pnand %p759_p1, %p756_p0 }
   0x6   :  { %764 = shalt.err (!%p761_p2)
}
   0x7   :  { %s765_s27 = scalar_lea.vmem %s23_s19, 2048  ;;  %p770_p4 = scmp.lt.s32.totalorder %s23_s19, %s23_s19 }
   0x8   :  { %p766_p3 = scmp.ne.s32.totalorder %s23_s19, %s765_s27  ;;  %p771_p5 = scmp.lt.s32.totalorder %s765_s27, %s765_s27 }
   0xa   :  { %p772_p6 = por %p771_p5, %p770_p4 }
   0xc   :  { %p773_p7 = pnand %p772_p6, %p766_p3 }
   0xe   :  { %776 = shalt.err (!%p773_p7)
}
   0xf   :  { %s780_s28 = smov 128   ;;  %s781_s29 = smov 8  }
  0x10   :  { %28 = dma.hbm_to_vmem [thread:$0]  %s977_s3, 2048, %s23_s19, [#allocation4], %s780_s28, %s780_s28, %s781_s29  }
  0x11   :  { %777 = dma.done.wait [#allocation4], 2048  }
  0x12   :  { %778 = vsyncadd [#allocation4], 4294965248  ;;  %v77_v0 = vld [vmem:[%s975_s1] sm:$0xff]  ;;  %v78_v1 = vld [vmem:[%s975_s1 + $0x8] sm:$0xff] }
  0x13   :  { %v79_v2 = vld [vmem:[%s975_s1 + $0x10] sm:$0xff]  ;;  %v688_v3 = vpack.c.bf16 %v78_v1, %v77_v0  ;;  %v80_v4 = vld [vmem:[%s975_s1 + $0x18] sm:$0xff]  ;;  %v81_v6 = vld [vmem:[%s975_s1 + $0x20] sm:$0xff] }
  0x14   :  { %v692_v5 = vpack.c.bf16 %v80_v4, %v79_v2  ;;  %v82_v7 = vld [vmem:[%s975_s1 + $0x28] sm:$0xff]  ;;  %v61_v9 = vld [vmem:[%s974_s0] sm:$0xff]  ;;  %v83_v10 = vld [vmem:[%s975_s1 + $0x30] sm:$0xff] }
  0x15   :  { %689 = vmatprep.subr.bf16.mxu0 %v688_v3  ;;  %v696_v8 = vpack.c.bf16 %v82_v7, %v81_v6  ;;  %v84_v11 = vld [vmem:[%s975_s1 + $0x38] sm:$0xff]  ;;  %608 = vmatprep.mubr.f32.mxu0 %v61_v9  ;;  %v85_v13 = vld [vmem:[%s975_s1 + $0x40] sm:$0xff]  ;;  %v86_v14 = vld [vmem:[%s975_s1 + $0x48] sm:$0xff] }
  0x16   :  { %691 = vmatpush3.bf16.msra.mxu0 %v688_v3  ;;  %v700_v12 = vpack.c.bf16 %v84_v11, %v83_v10  ;;  %v277_v15 = vld [vmem:[#allocation3] sm:$0xff]  ;;  %v278_v16 = vld [vmem:[#allocation3 + $0x8] sm:$0xff]  ;;  %v279_v17 = vld [vmem:[#allocation3 + $0x10] sm:$0xff]  ;;  %v704_v21 = vpack.c.bf16 %v86_v14, %v85_v13 }
  0x17   :  { %693 = vmatprep.subr.bf16.mxu0 %v692_v5  ;;  %v280_v18 = vld [vmem:[#allocation3 + $0x18] sm:$0xff]  ;;  %v720_v19 = vpack.c.bf16 %v278_v16, %v277_v15  ;;  %v281_v22 = vld [vmem:[#allocation3 + $0x20] sm:$0xff]  ;;  %v282_v23 = vld [vmem:[#allocation3 + $0x28] sm:$0xff] }
  0x18   :  { %v724_v20 = vpack.c.bf16 %v280_v18, %v279_v17  ;;  %v87_v24 = vld [vmem:[%s975_s1 + $0x50] sm:$0xff]  ;;  %v88_v25 = vld [vmem:[%s975_s1 + $0x58] sm:$0xff]  ;;  %v728_v26 = vpack.c.bf16 %v282_v23, %v281_v22  ;;  %v89_v30 = vld [vmem:[%s975_s1 + $0x60] sm:$0xff] }
  0x19   :  { %721 = vmatprep.subr.bf16.mxu1 %v720_v19  ;;  %v708_v27 = vpack.c.bf16 %v88_v25, %v87_v24  ;;  %v283_v28 = vld [vmem:[#allocation3 + $0x30] sm:$0xff]  ;;  %v284_v29 = vld [vmem:[#allocation3 + $0x38] sm:$0xff]  ;;  %v90_v31 = vld [vmem:[%s975_s1 + $0x68] sm:$0xff] }
  0x1a   :  { %695 = vmatpush3.bf16.msra.mxu0 %v692_v5  ;;  %723 = vmatpush3.bf16.msra.mxu1 %v720_v19  ;;  %v732_v32 = vpack.c.bf16 %v284_v29, %v283_v28  ;;  %v712_v33 = vpack.c.bf16 %v90_v31, %v89_v30  ;;  %v285_v34 = vld [vmem:[#allocation3 + $0x40] sm:$0xff]  ;;  %v286_v35 = vld [vmem:[#allocation3 + $0x48] sm:$0xff]  ;;  %v91_v36 = vld [vmem:[%s975_s1 + $0x70] sm:$0xff] }
  0x1b   :  { %697 = vmatprep.subr.bf16.mxu0 %v696_v8  ;;  %725 = vmatprep.subr.bf16.mxu1 %v724_v20  ;;  %v92_v37 = vld [vmem:[%s975_s1 + $0x78] sm:$0xff]  ;;  %v736_v38 = vpack.c.bf16 %v286_v35, %v285_v34  ;;  %v287_v40 = vld [vmem:[#allocation3 + $0x50] sm:$0xff]  ;;  %v289_v43 = vld [vmem:[#allocation3 + $0x60] sm:$0xff] }
  0x1c   :  { %v716_v39 = vpack.c.bf16 %v92_v37, %v91_v36  ;;  %v288_v41 = vld [vmem:[#allocation3 + $0x58] sm:$0xff]  ;;  %v290_v44 = vld [vmem:[#allocation3 + $0x68] sm:$0xff]  ;;  %v63_v47 = vld [vmem:[%s974_s0 + $0x10] sm:$0xff] }
  0x1d   :  { %v740_v42 = vpack.c.bf16 %v288_v41, %v287_v40  ;;  %v62_v45 = vld [vmem:[%s974_s0 + $0x8] sm:$0xff]  ;;  %v744_v46 = vpack.c.bf16 %v290_v44, %v289_v43  ;;  %v64_v48 = vld [vmem:[%s974_s0 + $0x18] sm:$0xff]  ;;  %v65_v49 = vld [vmem:[%s974_s0 + $0x20] sm:$0xff] }
  0x1e   :  { %699 = vmatpush3.bf16.msra.mxu0 %v696_v8  ;;  %727 = vmatpush3.bf16.msra.mxu1 %v724_v20  ;;  %v66_v50 = vld [vmem:[%s974_s0 + $0x28] sm:$0xff]  ;;  %v67_v51 = vld [vmem:[%s974_s0 + $0x30] sm:$0xff]  ;;  %v68_v52 = vld [vmem:[%s974_s0 + $0x38] sm:$0xff] }
  0x1f   :  { %701 = vmatprep.subr.bf16.mxu0 %v700_v12  ;;  %729 = vmatprep.subr.bf16.mxu1 %v728_v26  ;;  %v69_v53 = vld [vmem:[%s974_s0 + $0x40] sm:$0xff]  ;;  %v70_v54 = vld [vmem:[%s974_s0 + $0x48] sm:$0xff]  ;;  %v71_v55 = vld [vmem:[%s974_s0 + $0x50] sm:$0xff] }
  0x20   :  { %v72_v56 = vld [vmem:[%s974_s0 + $0x58] sm:$0xff]  ;;  %v73_v57 = vld [vmem:[%s974_s0 + $0x60] sm:$0xff]  ;;  %v74_v58 = vld [vmem:[%s974_s0 + $0x68] sm:$0xff] }
  0x21   :  { %v75_v59 = vld [vmem:[%s974_s0 + $0x70] sm:$0xff]  ;;  %v76_v60 = vld [vmem:[%s974_s0 + $0x78] sm:$0xff]  ;;  %v511_v0 = vld [vmem:[%s976_s2] ss:$0 sm:$0xff] }
  0x22   :  { %703 = vmatpush3.bf16.msra.mxu0 %v700_v12  ;;  %731 = vmatpush3.bf16.msra.mxu1 %v728_v26  ;;  %v291_v61 = vld [vmem:[#allocation3 + $0x70] sm:$0xff]  ;;  %v292_v62 = vld [vmem:[#allocation3 + $0x78] sm:$0xff] }
  0x23   :  { %705 = vmatprep.subr.bf16.mxu0 %v704_v21  ;;  %733 = vmatprep.subr.bf16.mxu1 %v732_v32  ;;  %v748_v63 = vpack.c.bf16 %v292_v62, %v291_v61 }
  0x26   :  { %707 = vmatpush3.bf16.msra.mxu0 %v704_v21  ;;  %735 = vmatpush3.bf16.msra.mxu1 %v732_v32 }
  0x27   :  { %709 = vmatprep.subr.bf16.mxu0 %v708_v27  ;;  %737 = vmatprep.subr.bf16.mxu1 %v736_v38 }
  0x2a   :  { %711 = vmatpush3.bf16.msra.mxu0 %v708_v27  ;;  %739 = vmatpush3.bf16.msra.mxu1 %v736_v38 }
  0x2b   :  { %713 = vmatprep.subr.bf16.mxu0 %v712_v33  ;;  %741 = vmatprep.subr.bf16.mxu1 %v740_v42 }
  0x2e   :  { %715 = vmatpush3.bf16.msra.mxu0 %v712_v33  ;;  %743 = vmatpush3.bf16.msra.mxu1 %v740_v42 }
  0x2f   :  { %717 = vmatprep.subr.bf16.mxu0 %v716_v39  ;;  %745 = vmatprep.subr.bf16.mxu1 %v744_v46 }
  0x32   :  { %719 = vmatpush3.bf16.msra.mxu0 %v716_v39  ;;  %747 = vmatpush3.bf16.msra.mxu1 %v744_v46 }
  0x33   :  { %749 = vmatprep.subr.bf16.mxu1 %v748_v63 }
  0x35   :  { %609 = vmatmul.mubr.f32.vlgmr.msra.gmra.mrb[0].mxu0 %v62_v45 }
  0x36   :  { %611 = vmatprep.mubr.f32.mxu0 %v63_v47  ;;  %751 = vmatpush3.bf16.msra.mxu1 %v748_v63 }
  0x39   :  { %612 = vmatmul.mubr.f32.gmra.mrb[2].mxu0 %v64_v48 }
  0x3a   :  { %614 = vmatprep.mubr.f32.mxu0 %v65_v49  ;;  %v510_v49 = vld [vmem:[%s978_s4] ss:$0 sm:$0xff] }
  0x3d   :  { %615 = vmatmul.mubr.f32.gmra.mrb[4].mxu0 %v66_v50 }
  0x3e   :  { %617 = vmatprep.mubr.f32.mxu0 %v67_v51 }
  0x41   :  { %618 = vmatmul.mubr.f32.gmra.mrb[6].mxu0 %v68_v52 }
  0x42   :  { %620 = vmatprep.mubr.f32.mxu0 %v69_v53 }
  0x45   :  { %621 = vmatmul.mubr.f32.gmra.mrb[8].mxu0 %v70_v54 }
  0x46   :  { %623 = vmatprep.mubr.f32.mxu0 %v71_v55 }
  0x49   :  { %624 = vmatmul.mubr.f32.gmra.mrb[10].mxu0 %v72_v56 }
  0x4a   :  { %626 = vmatprep.mubr.f32.mxu0 %v73_v57 }
  0x4d   :  { %627 = vmatmul.mubr.f32.gmra.mrb[12].mxu0 %v74_v58 }
  0x4e   :  { %629 = vmatprep.mubr.f32.mxu0 %v75_v59 }
  0x51   :  { %630 = vmatmul.mubr.f32.gmra.mrb[14].mxu0 %v76_v60 }
 0x108   :  { %v610_v1 = vpop.f32.mrb[0].mxu0 }
 0x109   :  { %v172_v2 = vadd.f32 %v610_v1, %v511_v0  ;;  %v166_v3 = vpop.f32.mrb[1].mxu0 }
 0x10a   :  { %v167_v4 = vadd.f32 %v511_v0, %v166_v3 }
 0x10b   :  { %v246_v7 = vmax.f32 %v172_v2, 0.0 }
 0x10c   :  { %v613_v5 = vpop.f32.mrb[2].mxu0  ;;  %v245_v6 = vmax.f32 %v167_v4, 0.0 }
 0x10d   :  { %v182_v8 = vadd.f32 %v613_v5, %v511_v0  ;;  %v176_v9 = vpop.f32.mrb[3].mxu0 }
 0x10e   :  { %v177_v10 = vadd.f32 %v511_v0, %v176_v9  ;;  %664 = vmatprep.mubr.f32.mxu1 %v245_v6 }
 0x10f   :  { %665 = vmatmul.mubr.f32.vlgmr.msra.gmra.mrb[0].mxu1 %v246_v7  ;;  %v248_v13 = vmax.f32 %v182_v8, 0.0 }
 0x110   :  { %v247_v11 = vmax.f32 %v177_v10, 0.0  ;;  %v616_v12 = vpop.f32.mrb[4].mxu0 }
 0x111   :  { %v192_v14 = vadd.f32 %v616_v12, %v511_v0  ;;  %v186_v15 = vpop.f32.mrb[5].mxu0 }
 0x112   :  { %v187_v16 = vadd.f32 %v511_v0, %v186_v15  ;;  %667 = vmatprep.mubr.f32.mxu1 %v247_v11 }
 0x113   :  { %668 = vmatmul.mubr.f32.gmra.mrb[2].mxu1 %v248_v13  ;;  %v250_v19 = vmax.f32 %v192_v14, 0.0 }
 0x114   :  { %v249_v17 = vmax.f32 %v187_v16, 0.0  ;;  %v619_v18 = vpop.f32.mrb[6].mxu0 }
 0x115   :  { %v202_v20 = vadd.f32 %v619_v18, %v511_v0  ;;  %v196_v21 = vpop.f32.mrb[7].mxu0 }
 0x116   :  { %v197_v22 = vadd.f32 %v511_v0, %v196_v21  ;;  %670 = vmatprep.mubr.f32.mxu1 %v249_v17 }
 0x117   :  { %671 = vmatmul.mubr.f32.gmra.mrb[4].mxu1 %v250_v19  ;;  %v252_v25 = vmax.f32 %v202_v20, 0.0 }
 0x118   :  { %v251_v23 = vmax.f32 %v197_v22, 0.0  ;;  %v622_v24 = vpop.f32.mrb[8].mxu0 }
 0x119   :  { %v212_v26 = vadd.f32 %v622_v24, %v511_v0  ;;  %v206_v27 = vpop.f32.mrb[9].mxu0 }
 0x11a   :  { %v207_v28 = vadd.f32 %v511_v0, %v206_v27  ;;  %673 = vmatprep.mubr.f32.mxu1 %v251_v23 }
 0x11b   :  { %674 = vmatmul.mubr.f32.gmra.mrb[6].mxu1 %v252_v25  ;;  %v254_v31 = vmax.f32 %v212_v26, 0.0 }
 0x11c   :  { %v253_v29 = vmax.f32 %v207_v28, 0.0  ;;  %v625_v30 = vpop.f32.mrb[10].mxu0 }
 0x11d   :  { %v222_v32 = vadd.f32 %v625_v30, %v511_v0  ;;  %v216_v33 = vpop.f32.mrb[11].mxu0 }
 0x11e   :  { %v217_v34 = vadd.f32 %v511_v0, %v216_v33  ;;  %676 = vmatprep.mubr.f32.mxu1 %v253_v29 }
 0x11f   :  { %677 = vmatmul.mubr.f32.gmra.mrb[8].mxu1 %v254_v31  ;;  %v256_v37 = vmax.f32 %v222_v32, 0.0 }
 0x120   :  { %v255_v35 = vmax.f32 %v217_v34, 0.0  ;;  %v628_v36 = vpop.f32.mrb[12].mxu0 }
 0x121   :  { %v232_v38 = vadd.f32 %v628_v36, %v511_v0  ;;  %v226_v39 = vpop.f32.mrb[13].mxu0 }
 0x122   :  { %v227_v40 = vadd.f32 %v511_v0, %v226_v39  ;;  %679 = vmatprep.mubr.f32.mxu1 %v255_v35 }
 0x123   :  { %680 = vmatmul.mubr.f32.gmra.mrb[10].mxu1 %v256_v37  ;;  %v258_v43 = vmax.f32 %v232_v38, 0.0 }
 0x124   :  { %v257_v41 = vmax.f32 %v227_v40, 0.0  ;;  %v631_v42 = vpop.f32.mrb[14].mxu0 }
 0x125   :  { %v242_v44 = vadd.f32 %v631_v42, %v511_v0  ;;  %v236_v45 = vpop.f32.mrb[15].mxu0 }
 0x126   :  { %v237_v46 = vadd.f32 %v511_v0, %v236_v45  ;;  %682 = vmatprep.mubr.f32.mxu1 %v257_v41 }
 0x127   :  { %683 = vmatmul.mubr.f32.gmra.mrb[12].mxu1 %v258_v43  ;;  %v260_v48 = vmax.f32 %v242_v44, 0.0 }
 0x128   :  { %v259_v47 = vmax.f32 %v237_v46, 0.0 }
 0x12a   :  { %685 = vmatprep.mubr.f32.mxu1 %v259_v47 }
 0x12b   :  { %686 = vmatmul.mubr.f32.gmra.mrb[14].mxu1 %v260_v48 }
 0x1e2   :  { %v666_v50 = vpop.f32.mrb[0].mxu1 }
 0x1e3   :  { %v439_v51 = vadd.f32 %v666_v50, %v510_v49  ;;  %v359_v52 = vpop.f32.mrb[1].mxu1 }
 0x1e4   :  { %v438_v53 = vadd.f32 %v510_v49, %v359_v52 }
 0x1e5   :  { %490 = vst [vmem:[%s979_s5 + $0x8] sm:$0xff] %v439_v51 }
 0x1e6   :  { %489 = vst [vmem:[%s979_s5] sm:$0xff] %v438_v53  ;;  %v669_v54 = vpop.f32.mrb[2].mxu1 }
 0x1e7   :  { %v441_v55 = vadd.f32 %v669_v54, %v510_v49  ;;  %v369_v56 = vpop.f32.mrb[3].mxu1 }
 0x1e8   :  { %v440_v57 = vadd.f32 %v510_v49, %v369_v56 }
 0x1e9   :  { %492 = vst [vmem:[%s979_s5 + $0x18] sm:$0xff] %v441_v55 }
 0x1ea   :  { %491 = vst [vmem:[%s979_s5 + $0x10] sm:$0xff] %v440_v57  ;;  %v672_v58 = vpop.f32.mrb[4].mxu1 }
 0x1eb   :  { %v443_v59 = vadd.f32 %v672_v58, %v510_v49  ;;  %v379_v60 = vpop.f32.mrb[5].mxu1 }
 0x1ec   :  { %v442_v61 = vadd.f32 %v510_v49, %v379_v60 }
 0x1ed   :  { %494 = vst [vmem:[%s979_s5 + $0x28] sm:$0xff] %v443_v59 }
 0x1ee   :  { %493 = vst [vmem:[%s979_s5 + $0x20] sm:$0xff] %v442_v61  ;;  %v675_v62 = vpop.f32.mrb[6].mxu1 }
 0x1ef   :  { %v445_v63 = vadd.f32 %v675_v62, %v510_v49  ;;  %v389_v0 = vpop.f32.mrb[7].mxu1 }
 0x1f0   :  { %v444_v1 = vadd.f32 %v510_v49, %v389_v0 }
 0x1f1   :  { %496 = vst [vmem:[%s979_s5 + $0x38] sm:$0xff] %v445_v63 }
 0x1f2   :  { %495 = vst [vmem:[%s979_s5 + $0x30] sm:$0xff] %v444_v1  ;;  %v678_v2 = vpop.f32.mrb[8].mxu1 }
 0x1f3   :  { %v447_v3 = vadd.f32 %v678_v2, %v510_v49  ;;  %v399_v4 = vpop.f32.mrb[9].mxu1 }
 0x1f4   :  { %v446_v5 = vadd.f32 %v510_v49, %v399_v4 }
 0x1f5   :  { %498 = vst [vmem:[%s979_s5 + $0x48] sm:$0xff] %v447_v3 }
 0x1f6   :  { %497 = vst [vmem:[%s979_s5 + $0x40] sm:$0xff] %v446_v5  ;;  %v681_v6 = vpop.f32.mrb[10].mxu1 }
 0x1f7   :  { %v449_v7 = vadd.f32 %v681_v6, %v510_v49  ;;  %v409_v8 = vpop.f32.mrb[11].mxu1 }
 0x1f8   :  { %v448_v9 = vadd.f32 %v510_v49, %v409_v8 }
 0x1f9   :  { %500 = vst [vmem:[%s979_s5 + $0x58] sm:$0xff] %v449_v7 }
 0x1fa   :  { %499 = vst [vmem:[%s979_s5 + $0x50] sm:$0xff] %v448_v9  ;;  %v684_v10 = vpop.f32.mrb[12].mxu1 }
 0x1fb   :  { %v451_v11 = vadd.f32 %v684_v10, %v510_v49  ;;  %v419_v12 = vpop.f32.mrb[13].mxu1 }
 0x1fc   :  { %v450_v13 = vadd.f32 %v510_v49, %v419_v12 }
 0x1fd   :  { %502 = vst [vmem:[%s979_s5 + $0x68] sm:$0xff] %v451_v11 }
 0x1fe   :  { %501 = vst [vmem:[%s979_s5 + $0x60] sm:$0xff] %v450_v13  ;;  %v687_v14 = vpop.f32.mrb[14].mxu1 }
 0x1ff   :  { %v453_v15 = vadd.f32 %v687_v14, %v510_v49  ;;  %v429_v16 = vpop.f32.mrb[15].mxu1 }
 0x200   :  { %v452_v17 = vadd.f32 %v510_v49, %v429_v16 }
 0x201   :  { %504 = vst [vmem:[%s979_s5 + $0x78] sm:$0xff] %v453_v15 }
 0x202   :  { %503 = vst [vmem:[%s979_s5 + $0x70] sm:$0xff] %v452_v17 }
 0x203   :  { %509 = vsyncpa [#allocation4], 1 }

</bundles_post_ra>
